<compile_context>
chip_gen: v7x
topology: tpu7x:2x2x1
jax: 0.10.0
libtpu: 0.0.40
codegen_flags: <defaults>
</compile_context>

<pallas_src>
import math

import jax
import jax.numpy as jnp
from jax.experimental import pallas as pl
from jax.experimental.pallas import tpu as pltpu

EPS = 1e-5  # PyTorch GroupNorm default eps


# --------------------------------- kernel -----------------------------------

def block_kernel(x_ref, wb_ref, bias_ref, gamma_ref, beta_ref, p_ref, o_ref):
    # x_ref : (Bblk, H+2, Wpad*Cin)  bf16   (pre-padded, lane-folded)
    # wb_ref: (3, Wpad*Cin, W*Coutp) bf16   (banded conv weight, per row-shift)
    # p_ref : (W*Coutp, W*Coutp)     f32    group reduce+scatter, 1/(H*W*cpg) folded in
    # o_ref : (Bblk, H, W*Coutp)
    Bblk, H, WCp = o_ref.shape
    WpC = x_ref.shape[2]

    # ---- conv3x3: three accumulated bf16 MXU pushes (K = Wpad*Cin each), f32 acc.
    xs = x_ref[:, 0:H, :].reshape(Bblk * H, WpC)
    acc = jnp.dot(xs, wb_ref[0], preferred_element_type=jnp.float32)
    for dy in (1, 2):
        xs = x_ref[:, dy:dy + H, :].reshape(Bblk * H, WpC)
        acc = acc + jnp.dot(xs, wb_ref[dy], preferred_element_type=jnp.float32)
    h = (acc + bias_ref[...]).reshape(Bblk, H, WCp)          # (Bblk, H, W*Coutp) f32

    # ---- GroupNorm: per-sample two-pass stats, single matmul per statistic.
    s1 = jnp.sum(h, axis=1)                                   # (Bblk, WCp)
    mean_c = jnp.dot(s1, p_ref[...],
                     preferred_element_type=jnp.float32)      # per-lane group mean
    d = h - mean_c[:, None, :]
    s2 = jnp.sum(d * d, axis=1)                               # (Bblk, WCp)
    var_c = jnp.dot(s2, p_ref[...],
                    preferred_element_type=jnp.float32)       # per-lane group var
    inv_c = jax.lax.rsqrt(var_c + EPS)

    # ---- affine + SiLU, lane-dense store ----
    y = d * inv_c[:, None, :] * gamma_ref[...] + beta_ref[...]
    o_ref[...] = (y * jax.lax.logistic(y)).astype(o_ref.dtype)


# -------------------------------- wrapper -----------------------------------

def _const_spec(shape):
    zeros = (0,) * len(shape)
    return pl.BlockSpec(shape, lambda b, _z=zeros: _z)


def _pick_block_batch(B, H, target_rows=256):
    """Largest-enough divisor of B so Bblk*H fills the MXU M-dim; keep >=2 grid
    steps when possible so the 'parallel' batch axis can feed 2 TCs (v7x)."""
    divs = [d for d in range(1, B + 1) if B % d == 0]
    good = [d for d in divs if d * H >= target_rows]
    good2 = [d for d in good if B // d >= 2]
    if good2:
        return good2[0]
    if good:
        return good[0]
    return divs[-1]


def _build_banded_weight(w_hwio, W, Wpad):
    """wb[dy, (xp, ci), (x, co)] = w[dy, xp - x, ci, co] if 0 <= xp - x < 3 else 0."""
    kh, kw, Cin, Cout = w_hwio.shape
    xp = jnp.arange(Wpad)[:, None]                    # padded column index
    xo = jnp.arange(W)[None, :]                       # output column index
    dx = xp - xo                                      # (Wpad, W)
    valid = (dx >= 0) & (dx < kw)
    dxc = jnp.clip(dx, 0, kw - 1)
    wg = w_hwio[:, dxc, :, :]                         # (kh, Wpad, W, Cin, Cout)
    wg = jnp.where(valid[None, :, :, None, None], wg, 0.0)
    wb = jnp.transpose(wg, (0, 1, 3, 2, 4))           # (kh, Wpad, Cin, W, Cout)
    return wb.reshape(kh, Wpad * Cin, W * Cout)


def block_forward(x_nchw, params, groups, out_dtype=jnp.float32):
    B, Cin, H, W = x_nchw.shape
    w = params["w"]                                   # (3, 3, Cin, Cout)  HWIO
    Cout = w.shape[-1]
    G = groups
    assert Cout % G == 0, "GroupNorm requires out_channels % groups == 0"

    # Pad Cout so W*Coutp is a multiple of 128 (lane-dense stores / GN math).
    unit_c = 128 // math.gcd(128, W)
    Cout_p = ((Cout + unit_c - 1) // unit_c) * unit_c
    WCp = W * Cout_p

    # Lane-align the folded padded width: Wpad*Cin must be a multiple of 128.
    unit_w = 128 // math.gcd(128, Cin)
    Wpad = ((W + 2 + unit_w - 1) // unit_w) * unit_w
    WpC = Wpad * Cin

    Bblk = _pick_block_batch(B, H)
    nsteps = B // Bblk

    # NCHW -> NHWC, zero-pad H by (1,1) and W by (1, Wpad-W-1), fold (W,Cin) -> lanes,
    # cast to bf16 once here (halves x DMA bytes; matmul consumes bf16 anyway).
    x = jnp.transpose(x_nchw, (0, 2, 3, 1)).astype(jnp.float32)
    xpad = jnp.pad(x, ((0, 0), (1, 1), (1, Wpad - W - 1), (0, 0)))
    xpad = xpad.reshape(B, H + 2, WpC).astype(jnp.bfloat16)

    # Parameters, zero-padded to Cout_p (padded channels: zero weight/affine).
    pad_c = Cout_p - Cout
    wp = jnp.pad(w, ((0, 0), (0, 0), (0, 0), (0, pad_c)))
    bp = jnp.pad(params["b"], (0, pad_c))
    gp = jnp.pad(params["g"], (0, pad_c))
    bep = jnp.pad(params["be"], (0, pad_c))

    wb = _build_banded_weight(wp, W, Wpad).astype(jnp.bfloat16)     # (3, WpC, WCp)
    bias_f = jnp.tile(bp, W).reshape(1, WCp).astype(jnp.float32)
    gamma_f = jnp.tile(gp, W).reshape(1, WCp).astype(jnp.float32)
    beta_f = jnp.tile(bep, W).reshape(1, WCp).astype(jnp.float32)

    # Group reduce+scatter matrix with 1/(H*W*cpg) folded in.  Padded channels
    # have index//cpg >= G, so their gmat rows are all-zero -> no stat leakage.
    cpg = Cout // G
    gmat = (jnp.arange(Cout_p)[:, None] // cpg ==
            jnp.arange(G)[None, :]).astype(jnp.float32)             # (Cout_p, G)
    gmatf = jnp.tile(gmat, (W, 1))                                  # (WCp, G)
    inv_n = 1.0 / float(H * W * cpg)
    P = (gmatf @ gmatf.T) * inv_n                                   # (WCp, WCp) f32

    # VMEM budget from the actual footprint (double-buffered blocks + f32
    # intermediates), capped at 48 MiB so v7x (64 MiB/TC) keeps headroom.
    out_itemsize = jnp.dtype(out_dtype).itemsize
    resident = (2 * Bblk * (H + 2) * WpC * 2          # x block (bf16) x2 buffers
                + 2 * int(wb.size) * 2                # banded weight (bf16)
                + 2 * 3 * WCp * 4                     # bias/gamma/beta
                + 2 * WCp * WCp * 4                   # P
                + 2 * Bblk * H * WCp * out_itemsize   # output block
                + 8 * Bblk * H * WCp * 4)             # f32 intermediates (h, d, y, ...)
    vmem_budget = int(min(48 * 1024 * 1024, max(32 * 1024 * 1024, 2 * resident)))

    cost = pl.CostEstimate(
        flops=int(2 * B * H * (3 * WpC) * WCp + 4 * B * WCp * WCp + 12 * B * H * WCp),
        transcendentals=int(B * H * WCp + B * WCp),
        bytes_accessed=int(xpad.size * 2 + wb.size * 2 + P.size * 4
                           + 3 * WCp * 4 + B * H * WCp * out_itemsize),
    )

    grid_spec = pltpu.PrefetchScalarGridSpec(
        num_scalar_prefetch=0,
        grid=(nsteps,),
        in_specs=[
            pl.BlockSpec((Bblk, H + 2, WpC), lambda b: (b, 0, 0)),  # pre-padded x
            _const_spec(wb.shape),       # banded conv weight
            _const_spec(bias_f.shape),   # conv bias (lane-folded)
            _const_spec(gamma_f.shape),  # GN weight (lane-folded)
            _const_spec(beta_f.shape),   # GN bias (lane-folded)
            _const_spec(P.shape),        # group reduce+scatter matrix
        ],
        out_specs=pl.BlockSpec((Bblk, H, WCp), lambda b: (b, 0, 0)),
    )

    out = pl.pallas_call(
        block_kernel,
        out_shape=jax.ShapeDtypeStruct((B, H, WCp), out_dtype),
        grid_spec=grid_spec,
        compiler_params=pltpu.CompilerParams(
            dimension_semantics=("parallel",),        # batch blocks are independent
            vmem_limit_bytes=vmem_budget,
        ),
        cost_estimate=cost,
    )(xpad, wb, bias_f, gamma_f, beta_f, P)

    # (B, H, W*Coutp) -> (B, H, W, Coutp) -> drop padded channels -> NCHW
    out = out.reshape(B, H, W, Cout_p)[..., :Cout]
    return jnp.transpose(out, (0, 3, 1, 2))


# ------------------------- pure-JAX reference (check) ------------------------

def reference_forward(x_nchw, params, groups):
    x = jnp.transpose(x_nchw, (0, 2, 3, 1)).astype(jnp.float32)
    y = jax.lax.conv_general_dilated(
        x, params["w"], (1, 1), "SAME",
        dimension_numbers=("NHWC", "HWIO", "NHWC")) + params["b"]
    B, H, W, C = y.shape
    cpg = C // groups
    yg = y.reshape(B, H, W, groups, cpg)
    mean = yg.mean(axis=(1, 2, 4), keepdims=True)
    var = yg.var(axis=(1, 2, 4), keepdims=True)
    yn = ((yg - mean) * jax.lax.rsqrt(var + EPS)).reshape(B, H, W, C)
    z = yn * params["g"] + params["be"]
    z = z * jax.nn.sigmoid(z)
    return jnp.transpose(z, (0, 3, 1, 2))


# --------------------------------- params -----------------------------------

def init_params(key, Cin, Cout):
    ks = jax.random.split(key, 4)

    def u(k, shape, scale):
        return jax.random.uniform(k, shape, jnp.float32, -1.0, 1.0) * scale

    return {
        "w": u(ks[0], (3, 3, Cin, Cout), 1.0 / math.sqrt(9 * Cin)),   # conv (HWIO)
        "b": u(ks[1], (Cout,), 0.1),                                  # conv bias
        "g": 1.0 + u(ks[2], (Cout,), 0.1),                            # GroupNorm weight
        "be": u(ks[3], (Cout,), 0.1),                                 # GroupNorm bias
    }


if __name__ == "__main__":
    B, Cin, Cout, H, W, G = 2, 4, 8, 16, 16, 4

    key = jax.random.PRNGKey(0)
    kx, kp = jax.random.split(key)
    x = jax.random.normal(kx, (B, Cin, H, W), jnp.float32)
    params = init_params(kp, Cin, Cout)

    out = block_forward(x, params, G)           # f32 output (module semantics)
    out = jax.block_until_ready(out)

    ref = reference_forward(x, params, G)
    assert out.shape == (B, Cout, H, W), out.shape
    max_err = float(jnp.max(jnp.abs(out - ref)))
    # bf16 matmul operands vs f32 reference -> loosened tolerance (stats are f32)
    assert jnp.allclose(out, ref, atol=5e-2, rtol=5e-2), max_err

    print("KERNEL_OK")
</pallas_src>

<mosaic_0001>
module attributes {stable_mosaic.version = 11 : i64} {
  func.func @block_kernel(%arg0: i32, %arg1: memref<2x18x128xbf16, #tpu.memory_space<vmem>>, %arg2: memref<3x128x128xbf16, #tpu.memory_space<vmem>>, %arg3: memref<1x128xf32, #tpu.memory_space<vmem>>, %arg4: memref<1x128xf32, #tpu.memory_space<vmem>>, %arg5: memref<1x128xf32, #tpu.memory_space<vmem>>, %arg6: memref<128x128xf32, #tpu.memory_space<vmem>>, %arg7: memref<2x16x128xf32, #tpu.memory_space<vmem>>) attributes {dimension_semantics = [#tpu.dimension_semantics<parallel>], iteration_bounds = array<i64: 1>, scalar_prefetch = 0 : i64, scratch_operands = 0 : i64, tpu.core_type = #tpu.core_type<tc>, window_params = [{transform_indices = @transform_0, window_bounds = array<i64: 2, 18, 128>}, {pipeline_mode = #tpu.pipeline_mode<synchronous>, transform_indices = @transform_1, window_bounds = array<i64: 3, 128, 128>}, {pipeline_mode = #tpu.pipeline_mode<synchronous>, transform_indices = @transform_2, window_bounds = array<i64: 1, 128>}, {pipeline_mode = #tpu.pipeline_mode<synchronous>, transform_indices = @transform_3, window_bounds = array<i64: 1, 128>}, {pipeline_mode = #tpu.pipeline_mode<synchronous>, transform_indices = @transform_4, window_bounds = array<i64: 1, 128>}, {pipeline_mode = #tpu.pipeline_mode<synchronous>, transform_indices = @transform_5, window_bounds = array<i64: 128, 128>}, {transform_indices = @transform_6, window_bounds = array<i64: 2, 16, 128>}]} {
    %c0 = arith.constant 0 : index
    %c0_0 = arith.constant 0 : index
    %c0_1 = arith.constant 0 : index
    %0 = vector.load %arg1[%c0, %c0_0, %c0_1] : memref<2x18x128xbf16, #tpu.memory_space<vmem>>, vector<2x16x128xbf16>
    %1 = vector.shape_cast %0 : vector<2x16x128xbf16> to vector<32x128xbf16>
    %c0_2 = arith.constant 0 : index
    %c0_3 = arith.constant 0 : index
    %c0_4 = arith.constant 0 : index
    %2 = vector.load %arg2[%c0_2, %c0_3, %c0_4] : memref<3x128x128xbf16, #tpu.memory_space<vmem>>, vector<1x128x128xbf16>
    %3 = vector.shape_cast %2 : vector<1x128x128xbf16> to vector<128x128xbf16>
    %cst = arith.constant dense<0.000000e+00> : vector<32x128xf32>
    %4 = tpu.matmul %1, %3, %cst {dimension_numbers = #tpu.dot_dimension_numbers<[1], [0], [0], [1], [0, 0, 1, 1], [], []>} : vector<32x128xbf16>, vector<128x128xbf16>, vector<32x128xf32> -> vector<32x128xf32>
    %c0_5 = arith.constant 0 : index
    %c1 = arith.constant 1 : index
    %c0_6 = arith.constant 0 : index
    %5 = vector.load %arg1[%c0_5, %c1, %c0_6] : memref<2x18x128xbf16, #tpu.memory_space<vmem>>, vector<2x16x128xbf16>
    %6 = vector.shape_cast %5 : vector<2x16x128xbf16> to vector<32x128xbf16>
    %c1_7 = arith.constant 1 : index
    %c0_8 = arith.constant 0 : index
    %c0_9 = arith.constant 0 : index
    %7 = vector.load %arg2[%c1_7, %c0_8, %c0_9] : memref<3x128x128xbf16, #tpu.memory_space<vmem>>, vector<1x128x128xbf16>
    %8 = vector.shape_cast %7 : vector<1x128x128xbf16> to vector<128x128xbf16>
    %cst_10 = arith.constant dense<0.000000e+00> : vector<32x128xf32>
    %9 = tpu.matmul %6, %8, %cst_10 {dimension_numbers = #tpu.dot_dimension_numbers<[1], [0], [0], [1], [0, 0, 1, 1], [], []>} : vector<32x128xbf16>, vector<128x128xbf16>, vector<32x128xf32> -> vector<32x128xf32>
    %10 = arith.addf %4, %9 : vector<32x128xf32>
    %c0_11 = arith.constant 0 : index
    %c2 = arith.constant 2 : index
    %c0_12 = arith.constant 0 : index
    %11 = vector.load %arg1[%c0_11, %c2, %c0_12] : memref<2x18x128xbf16, #tpu.memory_space<vmem>>, vector<2x16x128xbf16>
    %12 = vector.shape_cast %11 : vector<2x16x128xbf16> to vector<32x128xbf16>
    %c2_13 = arith.constant 2 : index
    %c0_14 = arith.constant 0 : index
    %c0_15 = arith.constant 0 : index
    %13 = vector.load %arg2[%c2_13, %c0_14, %c0_15] : memref<3x128x128xbf16, #tpu.memory_space<vmem>>, vector<1x128x128xbf16>
    %14 = vector.shape_cast %13 : vector<1x128x128xbf16> to vector<128x128xbf16>
    %cst_16 = arith.constant dense<0.000000e+00> : vector<32x128xf32>
    %15 = tpu.matmul %12, %14, %cst_16 {dimension_numbers = #tpu.dot_dimension_numbers<[1], [0], [0], [1], [0, 0, 1, 1], [], []>} : vector<32x128xbf16>, vector<128x128xbf16>, vector<32x128xf32> -> vector<32x128xf32>
    %16 = arith.addf %10, %15 : vector<32x128xf32>
    %c0_17 = arith.constant 0 : index
    %c0_18 = arith.constant 0 : index
    %17 = vector.load %arg3[%c0_17, %c0_18] : memref<1x128xf32, #tpu.memory_space<vmem>>, vector<1x128xf32>
    %18 = vector.broadcast %17 : vector<1x128xf32> to vector<32x128xf32>
    %19 = arith.addf %16, %18 : vector<32x128xf32>
    %20 = vector.shape_cast %19 : vector<32x128xf32> to vector<2x16x128xf32>
    %cst_19 = arith.constant dense<0.000000e+00> : vector<2x128xf32>
    %21 = vector.multi_reduction <add>, %20, %cst_19 [1] : vector<2x16x128xf32> to vector<2x128xf32>
    %c0_20 = arith.constant 0 : index
    %c0_21 = arith.constant 0 : index
    %22 = vector.load %arg6[%c0_20, %c0_21] : memref<128x128xf32, #tpu.memory_space<vmem>>, vector<128x128xf32>
    %cst_22 = arith.constant dense<0.000000e+00> : vector<2x128xf32>
    %23 = tpu.matmul %21, %22, %cst_22 {dimension_numbers = #tpu.dot_dimension_numbers<[1], [0], [0], [1], [0, 0, 1, 1], [], []>} : vector<2x128xf32>, vector<128x128xf32>, vector<2x128xf32> -> vector<2x128xf32>
    %24 = vector.shape_cast %23 : vector<2x128xf32> to vector<2x1x128xf32>
    %25 = vector.broadcast %24 : vector<2x1x128xf32> to vector<2x16x128xf32>
    %26 = arith.subf %20, %25 : vector<2x16x128xf32>
    %27 = arith.mulf %26, %26 : vector<2x16x128xf32>
    %cst_23 = arith.constant dense<0.000000e+00> : vector<2x128xf32>
    %28 = vector.multi_reduction <add>, %27, %cst_23 [1] : vector<2x16x128xf32> to vector<2x128xf32>
    %c0_24 = arith.constant 0 : index
    %c0_25 = arith.constant 0 : index
    %29 = vector.load %arg6[%c0_24, %c0_25] : memref<128x128xf32, #tpu.memory_space<vmem>>, vector<128x128xf32>
    %cst_26 = arith.constant dense<0.000000e+00> : vector<2x128xf32>
    %30 = tpu.matmul %28, %29, %cst_26 {dimension_numbers = #tpu.dot_dimension_numbers<[1], [0], [0], [1], [0, 0, 1, 1], [], []>} : vector<2x128xf32>, vector<128x128xf32>, vector<2x128xf32> -> vector<2x128xf32>
    %cst_27 = arith.constant 9.99999974E-6 : f32
    %31 = vector.broadcast %cst_27 : f32 to vector<2x128xf32>
    %32 = arith.addf %30, %31 : vector<2x128xf32>
    %33 = math.rsqrt %32 : vector<2x128xf32>
    %34 = vector.shape_cast %33 : vector<2x128xf32> to vector<2x1x128xf32>
    %35 = vector.broadcast %34 : vector<2x1x128xf32> to vector<2x16x128xf32>
    %36 = arith.mulf %26, %35 : vector<2x16x128xf32>
    %c0_28 = arith.constant 0 : index
    %c0_29 = arith.constant 0 : index
    %37 = vector.load %arg4[%c0_28, %c0_29] : memref<1x128xf32, #tpu.memory_space<vmem>>, vector<1x128xf32>
    %38 = vector.shape_cast %37 : vector<1x128xf32> to vector<1x1x128xf32>
    %39 = vector.broadcast %38 : vector<1x1x128xf32> to vector<2x16x128xf32>
    %40 = arith.mulf %36, %39 : vector<2x16x128xf32>
    %c0_30 = arith.constant 0 : index
    %c0_31 = arith.constant 0 : index
    %41 = vector.load %arg5[%c0_30, %c0_31] : memref<1x128xf32, #tpu.memory_space<vmem>>, vector<1x128xf32>
    %42 = vector.shape_cast %41 : vector<1x128xf32> to vector<1x1x128xf32>
    %43 = vector.broadcast %42 : vector<1x1x128xf32> to vector<2x16x128xf32>
    %44 = arith.addf %40, %43 : vector<2x16x128xf32>
    %45 = arith.negf %44 : vector<2x16x128xf32>
    %46 = math.exp %45 : vector<2x16x128xf32>
    %cst_32 = arith.constant 1.000000e+00 : f32
    %47 = vector.broadcast %cst_32 : f32 to vector<2x16x128xf32>
    %48 = arith.addf %47, %46 : vector<2x16x128xf32>
    %49 = arith.divf %47, %48 : vector<2x16x128xf32>
    %50 = arith.mulf %44, %49 : vector<2x16x128xf32>
    %c0_33 = arith.constant 0 : index
    %c0_34 = arith.constant 0 : index
    %c0_35 = arith.constant 0 : index
    %51 = vector.load %arg7[%c0_33, %c0_34, %c0_35] : memref<2x16x128xf32, #tpu.memory_space<vmem>>, vector<2x16x128xf32>
    tpu.vector_store %arg7[%c0_33, %c0_34, %c0_35], %50 {strides = array<i32>} : memref<2x16x128xf32, #tpu.memory_space<vmem>>, vector<2x16x128xf32>,
    return
  }
  func.func @transform_0(%arg0: i32) -> (i32, i32, i32) {
    %c0_i32 = arith.constant 0 : i32
    %c0_i32_0 = arith.constant 0 : i32
    %c0_i32_1 = arith.constant 0 : i32
    return %arg0, %c0_i32, %c0_i32_0 : i32, i32, i32
  }
  func.func @transform_1(%arg0: i32) -> (i32, i32, i32) {
    %c0_i32 = arith.constant 0 : i32
    %c0_i32_0 = arith.constant 0 : i32
    %c0_i32_1 = arith.constant 0 : i32
    %c0_i32_2 = arith.constant 0 : i32
    return %c0_i32, %c0_i32_0, %c0_i32_1 : i32, i32, i32
  }
  func.func @transform_2(%arg0: i32) -> (i32, i32) {
    %c0_i32 = arith.constant 0 : i32
    %c0_i32_0 = arith.constant 0 : i32
    %c0_i32_1 = arith.constant 0 : i32
    return %c0_i32, %c0_i32_0 : i32, i32
  }
  func.func @transform_3(%arg0: i32) -> (i32, i32) {
    %c0_i32 = arith.constant 0 : i32
    %c0_i32_0 = arith.constant 0 : i32
    %c0_i32_1 = arith.constant 0 : i32
    return %c0_i32, %c0_i32_0 : i32, i32
  }
  func.func @transform_4(%arg0: i32) -> (i32, i32) {
    %c0_i32 = arith.constant 0 : i32
    %c0_i32_0 = arith.constant 0 : i32
    %c0_i32_1 = arith.constant 0 : i32
    return %c0_i32, %c0_i32_0 : i32, i32
  }
  func.func @transform_5(%arg0: i32) -> (i32, i32) {
    %c0_i32 = arith.constant 0 : i32
    %c0_i32_0 = arith.constant 0 : i32
    %c0_i32_1 = arith.constant 0 : i32
    return %c0_i32, %c0_i32_0 : i32, i32
  }
  func.func @transform_6(%arg0: i32) -> (i32, i32, i32) {
    %c0_i32 = arith.constant 0 : i32
    %c0_i32_0 = arith.constant 0 : i32
    %c0_i32_1 = arith.constant 0 : i32
    return %arg0, %c0_i32, %c0_i32_0 : i32, i32, i32
  }
}

</mosaic_0001>

<bundles_post_ra>
// kernel: tpu_custom_call.1
= control target key start
LH: loop header
LB: loop body
LE: loop exit
PB: predicated region body
PF: predicated region fallthrough
CT: control target
= control target key end

     0   :  { %11 = vsyncpa [#allocation3], 0  ;;  %s1487_s0 = inlined_call_operand.vmem [shape: bf16[2,18,128], index: 0, kind: input, shape index: {}]   ;;  %s1488_s1 = inlined_call_operand.hbm [shape: bf16[3,128,128], index: 1, kind: input, shape index: {}]   ;;  %s1489_s2 = inlined_call_operand.vmem [shape: f32[1,128], index: 2, kind: input, shape index: {}]   ;;  %s1490_s3 = inlined_call_operand.vmem [shape: f32[1,128], index: 3, kind: input, shape index: {}]   ;;  %s1491_s4 = inlined_call_operand.vmem [shape: f32[1,128], index: 4, kind: input, shape index: {}]   ;;  %s1492_s5 = inlined_call_operand.hbm [shape: f32[128,128], index: 5, kind: input, shape index: {}]   ;;  %s1493_s6 = inlined_call_operand.hbm [shape: f32[2,16,128], index: 6, kind: output, shape index: {}]  }
   0x1   :  { %12 = vsyncpa [#allocation6], 0 }
   0x2   :  { %13 = vsyncpa [#allocation4], 0  ;;  %s1277_s21 = smov [#allocation2]   ;;  %s1205_s25 = scalar_lea.hbm %s1488_s1, 3072 }
   0x3   :  { %s21_s22 = sshll.u32 %s1277_s21, 4  ;;  %p1206_p0 = scmp.ne.s32.totalorder %s1488_s1, %s1205_s25  ;;  %s22_s22 = int_to_ptr.vmem [resolvable:$true] %s21_s22 }
   0x4   :  { %p1209_p1 = scmp.lt.u32.totalorder %s1205_s25, %s1488_s1 }
   0x6   :  { %p1211_p2 = pnand %p1209_p1, %p1206_p0 }
   0x8   :  { %1214 = shalt.err (!%p1211_p2)
}
   0x9   :  { %s1215_s30 = scalar_lea.vmem %s22_s22, 3072  ;;  %p1220_p4 = scmp.lt.s32.totalorder %s22_s22, %s22_s22 }
   0xa   :  { %p1216_p3 = scmp.ne.s32.totalorder %s22_s22, %s1215_s30  ;;  %p1221_p5 = scmp.lt.s32.totalorder %s1215_s30, %s1215_s30 }
   0xc   :  { %p1222_p6 = por %p1221_p5, %p1220_p4 }
   0xe   :  { %p1223_p7 = pnand %p1222_p6, %p1216_p3 }
  0x10   :  { %1226 = shalt.err (!%p1223_p7)
}
  0x11   :  { %s1278_s7 = smov 64   ;;  %s1279_s8 = smov 4  }
  0x12   :  { %27 = dma.hbm_to_vmem [thread:$0]  %s1488_s1, 3072, %s22_s22, [#allocation3], %s1278_s7, %s1278_s7, %s1279_s8  }
  0x13   :  { %s1280_s11 = smov [#allocation5]   ;;  %s1227_s15 = scalar_lea.hbm %s1492_s5, 2048 }
  0x14   :  { %s39_s12 = sshll.u32 %s1280_s11, 4  ;;  %p1228_p8 = scmp.ne.s32.totalorder %s1492_s5, %s1227_s15  ;;  %s40_s12 = int_to_ptr.vmem [resolvable:$true] %s39_s12 }
  0x15   :  { %p1231_p9 = scmp.lt.u32.totalorder %s1227_s15, %s1492_s5 }
  0x17   :  { %p1233_p10 = pnand %p1231_p9, %p1228_p8 }
  0x19   :  { %1236 = shalt.err (!%p1233_p10)
}
  0x1a   :  { %s1237_s20 = scalar_lea.vmem %s40_s12, 2048  ;;  %p1242_p12 = scmp.lt.s32.totalorder %s40_s12, %s40_s12 }
  0x1b   :  { %p1238_p11 = scmp.ne.s32.totalorder %s40_s12, %s1237_s20  ;;  %p1243_p13 = scmp.lt.s32.totalorder %s1237_s20, %s1237_s20 }
  0x1d   :  { %p1244_p0 = por %p1243_p13, %p1242_p12 }
  0x1f   :  { %p1245_p1 = pnand %p1244_p0, %p1238_p11 }
  0x21   :  { %1248 = shalt.err (!%p1245_p1)
}
  0x22   :  { %s1281_s1 = smov 128   ;;  %s1282_s21 = smov 8  }
  0x23   :  { %45 = dma.hbm_to_vmem [thread:$0]  %s1492_s5, 2048, %s40_s12, [#allocation6], %s1281_s1, %s1281_s1, %s1282_s21  }
  0x24   :  { %1271 = dma.done.wait [#allocation3], 3072  }
  0x25   :  { %1272 = vsyncadd [#allocation3], 4294964224 }
  0x26   :  { %1273 = dma.done.wait [#allocation6], 2048  }
  0x27   :  { %1274 = vsyncadd [#allocation6], 4294965248  ;;  %v1161_v0 = vld [vmem:[#allocation2] sm:$0xff]   ;;  %v1162_v1 = vld [vmem:[#allocation2 + $0x8] sm:$0xff]   ;;  %vm75_vm0 = vsmask.f32 3328 }
  0x28   :  { %984 = vmatprep.subr.bf16.mxu0 %v1161_v0  ;;  %v1163_v2 = vld [vmem:[#allocation2 + $0x10] sm:$0xff]   ;;  %v1164_v3 = vld [vmem:[#allocation2 + $0x18] sm:$0xff]   ;;  %v1169_v4 = vld [vmem:[#allocation2 + $0x40] sm:$0xff]   ;;  %vm76_vm1 = vsmask.f32 7440  ;;  %vm363_vm2 = vcmask 1042432  }
  0x29   :  { %985 = vmatpush3.bf16.msra.mxu0 %v1161_v0  ;;  %v53_v5 = vld [vmem:[%s1487_s0] sm:$0xf]  ;;  %v1356_v6 = vld [vmem:[%s1487_s0 + $0x4] sm:$0xf]  ;;  %964 = vmatprep.subr.bf16.mxu1 %v1169_v4  ;;  %v1172_v10 = vld [vmem:[#allocation2 + $0x48] sm:$0xff]   ;;  %vm364_vm3 = vcmask 1046532  }
  0x2a   :  { %986 = vmatprep.subr.bf16.mxu0 %v1162_v1  ;;  %v79_v7 = vshrl.u32 %v53_v5, 16  ;;  %v82_v8 = vshll.u32 %v53_v5, 16  ;;  %v871_v9 = vcombine.low %v53_v5, %v1356_v6  ;;  %965 = vmatpush3.bf16.msra.mxu1 %v1169_v4  ;;  %v1165_v11 = vld [vmem:[#allocation2 + $0x20] sm:$0xff]   ;;  %v92_v13 = vshrl.u32 %v1356_v6, 16  ;;  %v1175_v15 = vld [vmem:[#allocation2 + $0x50] sm:$0xff]   ;;  %v1166_v17 = vld [vmem:[#allocation2 + $0x28] sm:$0xff]  }
  0x2b   :  { %966 = vmatprep.subr.bf16.mxu1 %v1172_v10  ;;  %v1363_v16 = vld [vmem:[%s1487_s0 + $0xc] sm:$0xf]  ;;  %v1368_v18 = vld [vmem:[%s1487_s0 + $0x10] sm:$0xf]  ;;  %v1177_v20 = vld [vmem:[#allocation2 + $0x58] sm:$0xff]   ;;  %v88_v21 = vshll.u32 %v1356_v6, 16 }
  0x2c   :  { %1000 = vmatprep.mubr.bf16.mxu0 %v871_v9  ;;  %v81_v12 = vrot.slane %v79_v7, 4  ;;  %v84_v14 = vrot.slane %v82_v8, 5  ;;  %v103_v19 = vshrl.u32 %v1363_v16, 16  ;;  %v1167_v22 = vld [vmem:[#allocation2 + $0x30] sm:$0xff]   ;;  %v106_v23 = vshll.u32 %v1363_v16, 16  ;;  %v1179_v28 = vld [vmem:[#allocation2 + $0x60] sm:$0xff]   ;;  %vm1381_vm4 = vmor %vm75_vm0, %vm76_vm1 }
  0x2d   :  { %987 = vmatpush3.bf16.msra.mxu0 %v1162_v1  ;;  %v94_v24 = vrot.slane %v92_v13, 4  ;;  %v116_v25 = vshrl.u32 %v1368_v18, 16  ;;  %v90_v27 = vrot.slane %v88_v21, 5  ;;  %v368_v29 = vrot.slane %v1356_v6, 5  ;;  %v1168_v32 = vld [vmem:[#allocation2 + $0x38] sm:$0xff]   ;;  %v1181_v37 = vld [vmem:[#allocation2 + $0x68] sm:$0xff]   ;;  %vm1395_vm5 = vmor %vm363_vm2, %vm364_vm3 }
  0x2e   :  { %988 = vmatprep.subr.bf16.mxu0 %v1163_v2  ;;  %967 = vmatpush3.bf16.msra.mxu1 %v1172_v10  ;;  %v85_v26 = vor.u32 %v84_v14, %v81_v12  ;;  %v112_v31 = vshll.u32 %v1368_v18, 16  ;;  %v105_v33 = vrot.slane %v103_v19, 4  ;;  %v108_v34 = vrot.slane %v106_v23, 5  ;;  %v73_v39 = vld [vmem:[%s1487_s0 + $0x8] sm:$0x1]  ;;  %v1171_v50 = vld [vmem:[#allocation2 + $0x80] sm:$0xff]  }
  0x2f   :  { %968 = vmatprep.subr.bf16.mxu1 %v1175_v15  ;;  %v95_v30 = vor.u32 %v94_v24, %v90_v27  ;;  %v118_v36 = vrot.slane %v116_v25, 4  ;;  %v370_v42 = vrot.slane %v368_v29, 4  ;;  %v98_v43 = vshll.u32 %v73_v39, 16  ;;  %v1388_v46 = vld [vmem:[%s1487_s0 + $0x14] sm:$0x1]  ;;  %v1174_v0 = vld [vmem:[#allocation2 + $0x88] sm:$0xff]  }
  0x30   :  { %v86_v35 = vrot.slane %v85_v26, 4  ;;  %v114_v38 = vrot.slane %v112_v31, 5  ;;  %v371_v44 = vrot.slane %v73_v39, 5  ;;  %v109_v45 = vor.u32 %v108_v34, %v105_v33  ;;  %v357_v48 = vld [vmem:[%s1487_s0] sm:$0xe]  ;;  %v1183_v51 = vld [vmem:[#allocation2 + $0x70] sm:$0xff]  }
  0x31   :  { %989 = vmatpush3.bf16.msra.mxu0 %v1163_v2  ;;  %v96_v41 = vrot.slane %v95_v30, 4  ;;  %v100_v53 = vrot.slane %v98_v43, 5  ;;  %v122_v54 = vshll.u32 %v1388_v46, 16  ;;  %v881_v55 = vrot.slane %v357_v48, 9  ;;  %v1185_v1 = vld [vmem:[#allocation2 + $0x78] sm:$0xff]   ;;  %v1176_v5 = vld [vmem:[#allocation2 + $0x90] sm:$0xff]  }
  0x32   :  { %990 = vmatprep.subr.bf16.mxu0 %v1164_v3  ;;  %969 = vmatpush3.bf16.msra.mxu1 %v1175_v15  ;;  %v119_v47 = vor.u32 %v118_v36, %v114_v38  ;;  %v91_v52 = vsel %vm1381_vm4, %v86_v35, %v90_v27  ;;  %v872_v56 = vcombine.low %v1363_v16, %v1368_v18  ;;  %v110_v58 = vrot.slane %v109_v45, 4  ;;  %v531_v6 = vld [vmem:[#allocation5] sm:$0xff]  ;;  %v532_v7 = vld [vmem:[#allocation5 + $0x8] sm:$0xff]  ;;  %v1178_v10 = vld [vmem:[#allocation2 + $0x98] sm:$0xff]  }
  0x33   :  { %970 = vmatprep.subr.bf16.mxu1 %v1177_v20  ;;  %v101_v57 = vsel %vm1381_vm4, %v96_v41, %v100_v53  ;;  %v372_v59 = vsel %vm1395_vm5, %v370_v42, %v371_v44  ;;  %v124_v62 = vrot.slane %v122_v54, 5  ;;  %v369_v63 = vsel %vm1395_vm5, %v881_v55, %v368_v29  ;;  %v533_v12 = vld [vmem:[#allocation5 + $0x10] sm:$0xff]  ;;  %v534_v13 = vld [vmem:[#allocation5 + $0x18] sm:$0xff]  ;;  %v1180_v15 = vld [vmem:[#allocation2 + $0xa0] sm:$0xff]  }
  0x34   :  { %v861_v60 = vcombine.low %v91_v52, %v101_v57  ;;  %v120_v61 = vrot.slane %v119_v47, 4  ;;  %v883_v2 = vcombine.low %v369_v63, %v372_v59  ;;  %v1414_v9 = vpack.c.bf16 %v532_v7, %v531_v6  ;;  %v1182_v16 = vld [vmem:[#allocation2 + $0xa8] sm:$0xff]   ;;  %v1184_v19 = vld [vmem:[#allocation2 + $0xb0] sm:$0xff]   ;;  %v1186_v24 = vld [vmem:[#allocation2 + $0xb8] sm:$0xff]  }
  0x35   :  { %991 = vmatpush3.bf16.msra.mxu0 %v1164_v3  ;;  %v115_v3 = vsel %vm1381_vm4, %v110_v58, %v114_v38  ;;  %v1418_v14 = vpack.c.bf16 %v534_v13, %v533_v12  ;;  %v378_v21 = vrot.slane %v1388_v46, 5  ;;  %v535_v27 = vld [vmem:[#allocation5 + $0x20] sm:$0xff]  ;;  %v537_v30 = vld [vmem:[#allocation5 + $0x30] sm:$0xff]  ;;  %v538_v31 = vld [vmem:[#allocation5 + $0x38] sm:$0xff]  ;;  %vm1284_vm6 = vmmov 0  }
  0x36   :  { %992 = vmatprep.subr.bf16.mxu0 %v1165_v11  ;;  %971 = vmatpush3.bf16.msra.mxu1 %v1177_v20  ;;  %v125_v4 = vsel %vm1381_vm4, %v120_v61, %v124_v62  ;;  %v358_v20 = vld [vmem:[%s1487_s0 + $0xc] sm:$0xe]  ;;  %v539_v33 = vld [vmem:[#allocation5 + $0x40] sm:$0xff]  ;;  %v541_v36 = vld [vmem:[#allocation5 + $0x50] sm:$0xff]  ;;  %v1285_v45 = vmov 0.0   ;;  %vm549_vm7 = vcmask 1041409  }
  0x37   :  { %972 = vmatprep.subr.bf16.mxu1 %v1179_v28  ;;  %980 = vmatprep.mubr.bf16.mxu1 %v861_v60  ;;  %v862_v8 = vcombine.low %v115_v3, %v125_v4  ;;  %v540_v34 = vld [vmem:[#allocation5 + $0x48] sm:$0xff]  ;;  %v543_v39 = vld [vmem:[#allocation5 + $0x60] sm:$0xff]  ;;  %v545_v42 = vld [vmem:[#allocation5 + $0x70] sm:$0xff] }
  0x38   :  { %v1440_v35 = vpack.c.bf16 %v540_v34, %v539_v33  ;;  %v544_v40 = vld [vmem:[#allocation5 + $0x68] sm:$0xff]  ;;  %v546_v43 = vld [vmem:[#allocation5 + $0x78] sm:$0xff]  ;;  %v893_v53 = vld [vmem:[%s1489_s2] ss:$0 sm:$0xff] }
  0x39   :  { %993 = vmatpush3.bf16.msra.mxu0 %v1165_v11  ;;  %v1283_v11 = vmov 0.0|0.0   ;;  %v1113_v41 = vpack.c.bf16 %v544_v40, %v543_v39  ;;  %v1116_v44 = vpack.c.bf16 %v546_v43, %v545_v42 }
  0x3a   :  { %994 = vmatprep.subr.bf16.mxu0 %v1166_v17  ;;  %973 = vmatpush3.bf16.msra.mxu1 %v1179_v28  ;;  %v536_v28 = vld [vmem:[#allocation5 + $0x28] sm:$0xff] }
  0x3b   :  { %974 = vmatprep.subr.bf16.mxu1 %v1181_v37  ;;  %v1432_v29 = vpack.c.bf16 %v536_v28, %v535_v27 }
  0x3d   :  { %995 = vmatpush3.bf16.msra.mxu0 %v1166_v17  ;;  %v375_v17 = vrot.slane %v1368_v18, 5 }
  0x3e   :  { %996 = vmatprep.subr.bf16.mxu0 %v1167_v22  ;;  %975 = vmatpush3.bf16.msra.mxu1 %v1181_v37  ;;  %v542_v37 = vld [vmem:[#allocation5 + $0x58] sm:$0xff] }
  0x3f   :  { %976 = vmatprep.subr.bf16.mxu1 %v1183_v51  ;;  %v377_v23 = vrot.slane %v375_v17, 4  ;;  %v1110_v38 = vpack.c.bf16 %v542_v37, %v541_v36 }
  0x41   :  { %997 = vmatpush3.bf16.msra.mxu0 %v1167_v22  ;;  %v882_v22 = vrot.slane %v358_v20, 9  ;;  %v379_v18 = vsel %vm1395_vm5, %v377_v23, %v378_v21 }
  0x42   :  { %998 = vmatprep.subr.bf16.mxu0 %v1168_v32  ;;  %977 = vmatpush3.bf16.msra.mxu1 %v1183_v51 }
  0x43   :  { %978 = vmatprep.subr.bf16.mxu1 %v1185_v1  ;;  %v376_v25 = vsel %vm1395_vm5, %v882_v22, %v375_v17  ;;  %v626_v17 = vlaneseq }
  0x44   :  { %v884_v26 = vcombine.low %v376_v25, %v379_v18 }
  0x45   :  { %999 = vmatpush3.bf16.msra.mxu0 %v1168_v32  ;;  %v1436_v32 = vpack.c.bf16 %v538_v31, %v537_v30  ;;  %v627_v20 = vshrl.u32 %v626_v17, 7 }
  0x46   :  { %1004 = vmatprep.subr.bf16.mxu0 %v1171_v50  ;;  %979 = vmatpush3.bf16.msra.mxu1 %v1185_v1 }
  0x47   :  { %1094 = vmatprep.subr.bf16.mxu1 %v1283_v11 }
  0x48   :  { %1001 = vmatmul.mubr.bf16.vlgmr.msra.gmra.mrb[0].mxu0 %v872_v56 }
  0x49   :  { %1005 = vmatpush3.bf16.msra.mxu0 %v1171_v50  ;;  %1020 = vmatprep.mubr.bf16.mxu0 %v883_v2 }
  0x4a   :  { %1006 = vmatprep.subr.bf16.mxu0 %v1174_v0  ;;  %981 = vmatmul.mubr.bf16.vlgmr.msra.gmra.mrb[0].mxu1 %v862_v8 }
  0x4b   :  { %1096 = vmatpush3.bf16.msra.mxu1 %v1414_v9  ;;  %1056 = vmatprep.mubr.msk.f32.mxu1 %vm1284_vm6, %v1285_v45 }
  0x4c   :  { %1097 = vmatprep.subr.bf16.mxu1 %v1283_v11 }
  0x4d   :  { %1007 = vmatpush3.bf16.msra.mxu0 %v1174_v0 }
  0x4e   :  { %1008 = vmatprep.subr.bf16.mxu0 %v1176_v5 }
  0x4f   :  { %1099 = vmatpush3.bf16.msra.mxu1 %v1418_v14 }
  0x50   :  { %1100 = vmatprep.subr.bf16.mxu1 %v1283_v11 }
  0x51   :  { %1009 = vmatpush3.bf16.msra.mxu0 %v1176_v5 }
  0x52   :  { %1010 = vmatprep.subr.bf16.mxu0 %v1178_v10 }
  0x53   :  { %1102 = vmatpush3.bf16.msra.mxu1 %v1432_v29 }
  0x54   :  { %1103 = vmatprep.subr.bf16.mxu1 %v1283_v11 }
  0x55   :  { %1011 = vmatpush3.bf16.msra.mxu0 %v1178_v10 }
  0x56   :  { %1012 = vmatprep.subr.bf16.mxu0 %v1180_v15 }
  0x57   :  { %1105 = vmatpush3.bf16.msra.mxu1 %v1436_v32 }
  0x58   :  { %1106 = vmatprep.subr.bf16.mxu1 %v1283_v11 }
  0x59   :  { %1013 = vmatpush3.bf16.msra.mxu0 %v1180_v15 }
  0x5a   :  { %1014 = vmatprep.subr.bf16.mxu0 %v1182_v16 }
  0x5b   :  { %1108 = vmatpush3.bf16.msra.mxu1 %v1440_v35 }
  0x5c   :  { %1109 = vmatprep.subr.bf16.mxu1 %v1283_v11 }
  0x5d   :  { %1015 = vmatpush3.bf16.msra.mxu0 %v1182_v16 }
  0x5e   :  { %1016 = vmatprep.subr.bf16.mxu0 %v1184_v19 }
  0x5f   :  { %1111 = vmatpush3.bf16.msra.mxu1 %v1110_v38 }
  0x60   :  { %1112 = vmatprep.subr.bf16.mxu1 %v1283_v11 }
  0x61   :  { %1017 = vmatpush3.bf16.msra.mxu0 %v1184_v19 }
  0x62   :  { %1018 = vmatprep.subr.bf16.mxu0 %v1186_v24 }
  0x63   :  { %1114 = vmatpush3.bf16.msra.mxu1 %v1113_v41 }
  0x64   :  { %1115 = vmatprep.subr.bf16.mxu1 %v1283_v11 }
  0x65   :  { %1019 = vmatpush3.bf16.msra.mxu0 %v1186_v24  ;;  %v647_v24 = vsub.s32 0, %v627_v20 }
  0x67   :  { %1117 = vmatpush3.bf16.msra.mxu1 %v1116_v44 }
  0x68   :  { %1021 = vmatmul.mubr.bf16.vlgmr.msra.gmra.mrb[0].mxu0 %v884_v26  ;;  %1118 = vmatprep.subr.bf16.mxu1 %v1283_v11 }
 0x11d   :  { %v982_v46 = vpop.f32.mrb[0].mxu1 }
 0x11e   :  { %v233_v47 = vpop.f32.mrb[1].mxu1 }
 0x11f   :  { %v983_v48 = vpop.f32.mrb[2].mxu1 }
 0x120   :  { %v236_v49 = vpop.f32.mrb[3].mxu1 }
 0x13b   :  { %v1022_v50 = vpop.f32.mrb[0].mxu0 }
 0x13c   :  { %v1142_v51 = vadd.f32 %v1022_v50, %v982_v46  ;;  %v487_v52 = vpop.f32.mrb[1].mxu0 }
 0x13d   :  { %v1143_v54 = vadd.f32 %v487_v52, %v233_v47  ;;  %v1023_v55 = vpop.f32.mrb[2].mxu0 }
 0x13e   :  { %v1144_v56 = vadd.f32 %v1023_v55, %v983_v48  ;;  %v490_v57 = vpop.f32.mrb[3].mxu0  ;;  %v515_v59 = vadd.f32 %v1142_v51, %v893_v53 }
 0x13f   :  { %v1145_v58 = vadd.f32 %v490_v57, %v236_v49  ;;  %v513_v61 = vadd.f32 %v1143_v54, %v893_v53 }
 0x140   :  { %v516_v60 = vadd.f32 %v1144_v56, %v893_v53 }
 0x141   :  { %v514_v62 = vadd.f32 %v1145_v58, %v893_v53 }
 0x142   :  { %v524_v63 = vadd.f32 %v516_v60, %v515_v59 }
 0x143   :  { %v517_v0 = vadd.f32 %v514_v62, %v513_v61 }
 0x144   :  { %v525_v1 = vrot.slane %v524_v63, 4 }
 0x145   :  { %v518_v2 = vrot.slane %v517_v0, 4 }
 0x146   :  { %v526_v3 = vadd.f32 %v525_v1, %v524_v63  ;;  %v895_v1 = vld [vmem:[%s1491_s4] ss:$0 sm:$0xff] }
 0x147   :  { %v519_v4 = vadd.f32 %v518_v2, %v517_v0 }
 0x148   :  { %v527_v5 = vrot.slane %v526_v3, 2 }
 0x149   :  { %v520_v6 = vrot.slane %v519_v4, 2 }
 0x14a   :  { %v528_v7 = vadd.f32 %v527_v5, %v526_v3 }
 0x14b   :  { %v521_v8 = vadd.f32 %v520_v6, %v519_v4 }
 0x14c   :  { %v529_v10 = vrot.slane %v528_v7, 1 }
 0x14d   :  { %v522_v12 = vrot.slane %v521_v8, 1 }
 0x14e   :  { %v530_v13 = vadd.f32 %v529_v10, %v528_v7 }
 0x14f   :  { %v523_v15 = vadd.f32 %v522_v12, %v521_v8 }
 0x151   :  { %v550_v16 = vsel %vm549_vm7, %v530_v13, %v523_v15 }
 0x152   :  { %1057 = vmatmul.mubr.f32.vlgmr.msra.gmra.mrb[4].mxu1 %v550_v16 }
 0x153   :  { %1120 = vmatpush3.bf16.msra.mxu1 %v1414_v9  ;;  %1091 = vmatprep.mubr.msk.f32.mxu1 %vm1284_vm6, %v1285_v45  ;;  %v1286_v9 = vmov 1966171168  }
 0x154   :  { %1121 = vmatprep.subr.bf16.mxu1 %v1283_v11 }
 0x157   :  { %1123 = vmatpush3.bf16.msra.mxu1 %v1418_v14  ;;  %v624_v14 = vunpack.c.l.s4 %v1286_v9 }
 0x158   :  { %1124 = vmatprep.subr.bf16.mxu1 %v1283_v11 }
 0x159   :  { %v625_v19 = vunpack.c.0.s8 %v624_v14 }
 0x15b   :  { %1126 = vmatpush3.bf16.msra.mxu1 %v1432_v29  ;;  %v628_v21 = vsub.s32 %v625_v19, %v627_v20 }
 0x15c   :  { %1127 = vmatprep.subr.bf16.mxu1 %v1283_v11 }
 0x15f   :  { %1129 = vmatpush3.bf16.msra.mxu1 %v1436_v32 }
 0x160   :  { %1130 = vmatprep.subr.bf16.mxu1 %v1283_v11 }
 0x163   :  { %1132 = vmatpush3.bf16.msra.mxu1 %v1440_v35 }
 0x164   :  { %1133 = vmatprep.subr.bf16.mxu1 %v1283_v11 }
 0x167   :  { %1135 = vmatpush3.bf16.msra.mxu1 %v1110_v38 }
 0x168   :  { %1136 = vmatprep.subr.bf16.mxu1 %v1283_v11 }
 0x16b   :  { %1138 = vmatpush3.bf16.msra.mxu1 %v1113_v41 }
 0x16c   :  { %1139 = vmatprep.subr.bf16.mxu1 %v1283_v11 }
 0x16f   :  { %1141 = vmatpush3.bf16.msra.mxu1 %v1116_v44 }
 0x225   :  { %v618_v22 = vpop.f32.mrb[4].mxu1 }
 0x226   :  { %v629_v23 = vrot.slane %v618_v22, %v628_v21  ;;  %v1058_v25 = vpop.f32.mrb[5].mxu1 }
 0x228   :  { %v630_v18 = vcombine.high %v629_v23, %v629_v23  ;;  %v637_v26 = vrot.slane %v629_v23, %v628_v21 }
 0x22a   :  { %v644_v27 = vrot.slane %v630_v18, %v628_v21  ;;  %v648_v28 = vrot.slane %v637_v26, %v647_v24 }
 0x22c   :  { %v652_v29 = vrot.slane %v644_v27, %v647_v24  ;;  %v655_v30 = vsub.f32 %v513_v61, %v648_v28  ;;  %v656_v31 = vsub.f32 %v514_v62, %v648_v28  ;;  %v894_v61 = vld [vmem:[%s1490_s3] ss:$0 sm:$0xff]  ;;  %s1287_s3 = smov [#allocation7]  }
 0x22d   :  { %s848_s4 = sshll.u32 %s1287_s3, 4  ;;  %s849_s4 = int_to_ptr.vmem [resolvable:$true] %s848_s4 }
 0x22e   :  { %v657_v32 = vsub.f32 %v515_v59, %v652_v29  ;;  %v658_v11 = vsub.f32 %v516_v60, %v652_v29  ;;  %v659_v33 = vmul.f32 %v655_v30, %v655_v30  ;;  %v660_v34 = vmul.f32 %v656_v31, %v656_v31  ;;  %s1249_s19 = scalar_lea.vmem %s849_s4, 512  ;;  %p1254_p3 = scmp.lt.s32.totalorder %s849_s4, %s849_s4 }
 0x22f   :  { %p1250_p2 = scmp.ne.s32.totalorder %s849_s4, %s1249_s19  ;;  %p1255_p4 = scmp.lt.s32.totalorder %s1249_s19, %s1249_s19 }
 0x230   :  { %v661_v35 = vmul.f32 %v657_v32, %v657_v32  ;;  %v662_v36 = vmul.f32 %v658_v11, %v658_v11  ;;  %v663_v37 = vadd.f32 %v660_v34, %v659_v33 }
 0x231   :  { %p1256_p5 = por %p1255_p4, %p1254_p3 }
 0x232   :  { %v664_v38 = vrot.slane %v663_v37, 4  ;;  %v670_v39 = vadd.f32 %v662_v36, %v661_v35 }
 0x233   :  { %p1257_p6 = pnand %p1256_p5, %p1250_p2 }
 0x234   :  { %v665_v40 = vadd.f32 %v664_v38, %v663_v37  ;;  %v671_v41 = vrot.slane %v670_v39, 4 }
 0x236   :  { %v666_v42 = vrot.slane %v665_v40, 2  ;;  %v672_v43 = vadd.f32 %v671_v41, %v670_v39 }
 0x238   :  { %v667_v44 = vadd.f32 %v666_v42, %v665_v40  ;;  %v673_v45 = vrot.slane %v672_v43, 2 }
 0x23a   :  { %v668_v46 = vrot.slane %v667_v44, 1  ;;  %v674_v47 = vadd.f32 %v673_v45, %v672_v43 }
 0x23c   :  { %v675_v48 = vrot.slane %v674_v47, 1  ;;  %v669_v49 = vadd.f32 %v668_v46, %v667_v44 }
 0x23e   :  { %v676_v50 = vadd.f32 %v675_v48, %v674_v47 }
 0x240   :  { %v679_v51 = vsel %vm549_vm7, %v676_v50, %v669_v49 }
 0x241   :  { %1092 = vmatmul.mubr.f32.vlgmr.msra.gmra.mrb[6].mxu1 %v679_v51 }
 0x314   :  { %v747_v52 = vpop.f32.mrb[6].mxu1 }
 0x315   :  { %v748_v53 = vadd.f32 1e-05, %v747_v52  ;;  %v1093_v54 = vpop.f32.mrb[7].mxu1 }
 0x317   :  { %1187 = vrsqrt.f32 %v748_v53 }
 0x321   :  { %v1188_v55 = vpop.eup %1187 }
 0x322   :  { %v759_v56 = vrot.slane %v1188_v55, %v628_v21 }
 0x324   :  { %v760_v57 = vcombine.high %v759_v56, %v759_v56  ;;  %v767_v58 = vrot.slane %v759_v56, %v628_v21 }
 0x326   :  { %v774_v59 = vrot.slane %v760_v57, %v628_v21  ;;  %v778_v60 = vrot.slane %v767_v58, %v647_v24 }
 0x328   :  { %v782_v62 = vrot.slane %v774_v59, %v647_v24  ;;  %v785_v63 = vmul.f32 %v778_v60, %v655_v30  ;;  %v786_v0 = vmul.f32 %v778_v60, %v656_v31 }
 0x32a   :  { %v787_v2 = vmul.f32 %v782_v62, %v657_v32  ;;  %v788_v3 = vmul.f32 %v782_v62, %v658_v11  ;;  %v796_v4 = vmul.f32 %v894_v61, %v785_v63  ;;  %v797_v5 = vmul.f32 %v894_v61, %v786_v0 }
 0x32c   :  { %v798_v6 = vmul.f32 %v894_v61, %v787_v2  ;;  %v799_v7 = vmul.f32 %v894_v61, %v788_v3  ;;  %v807_v8 = vadd.f32 %v895_v1, %v796_v4  ;;  %v808_v10 = vadd.f32 %v895_v1, %v797_v5 }
 0x32e   :  { %v809_v12 = vadd.f32 %v895_v1, %v798_v6  ;;  %v810_v13 = vadd.f32 %v895_v1, %v799_v7  ;;  %v896_v15 = vmul.f32 -1.442695, %v807_v8  ;;  %v897_v16 = vmul.f32 -1.442695, %v808_v10 }
 0x330   :  { %1189 = vpow2.f32 %v896_v15  ;;  %v898_v9 = vmul.f32 -1.442695, %v809_v12  ;;  %v899_v14 = vmul.f32 -1.442695, %v810_v13 }
 0x331   :  { %1191 = vpow2.f32 %v897_v16 }
 0x332   :  { %1193 = vpow2.f32 %v898_v9 }
 0x333   :  { %1195 = vpow2.f32 %v899_v14 }
 0x33a   :  { %v1190_v17 = vpop.eup %1189 }
 0x33b   :  { %v1192_v19 = vpop.eup %1191  ;;  %v823_v20 = vadd.f32 1.0, %v1190_v17 }
 0x33c   :  { %v1194_v21 = vpop.eup %1193  ;;  %v824_v22 = vadd.f32 1.0, %v1192_v19 }
 0x33d   :  { %v1196_v23 = vpop.eup %1195  ;;  %v825_v24 = vadd.f32 1.0, %v1194_v21  ;;  %1197 = vrcp.f32 %v823_v20 }
 0x33e   :  { %v826_v25 = vadd.f32 1.0, %v1196_v23  ;;  %1199 = vrcp.f32 %v824_v22 }
 0x33f   :  { %1201 = vrcp.f32 %v825_v24 }
 0x340   :  { %1203 = vrcp.f32 %v826_v25 }
 0x347   :  { %v1198_v18 = vpop.eup %1197 }
 0x348   :  { %v1200_v26 = vpop.eup %1199  ;;  %v835_v27 = vmul.f32 %v1198_v18, %v807_v8 }
 0x349   :  { %v1202_v28 = vpop.eup %1201  ;;  %v836_v29 = vmul.f32 %v1200_v26, %v808_v10 }
 0x34a   :  { %v1204_v30 = vpop.eup %1203  ;;  %v837_v31 = vmul.f32 %v1202_v28, %v809_v12  ;;  %839 = vst [vmem:[#allocation7] sm:$0xff] %v835_v27 }
 0x34b   :  { %v838_v32 = vmul.f32 %v1204_v30, %v810_v13  ;;  %840 = vst [vmem:[#allocation7 + $0x8] sm:$0xff] %v836_v29 }
 0x34c   :  { %841 = vst [vmem:[#allocation7 + $0x10] sm:$0xff] %v837_v31 }
 0x34d   :  { %842 = vst [vmem:[#allocation7 + $0x18] sm:$0xff] %v838_v32 }
 0x34e   :  { %1260 = shalt.err (!%p1257_p6)
}
 0x34f   :  { %s1261_s23 = scalar_lea.hbm %s1493_s6, 512 }
 0x350   :  { %p1262_p7 = scmp.ne.s32.totalorder %s1493_s6, %s1261_s23  ;;  %p1265_p8 = scmp.lt.u32.totalorder %s1261_s23, %s1493_s6 }
 0x352   :  { %p1267_p9 = pnand %p1265_p8, %p1262_p7 }
 0x354   :  { %1270 = shalt.err (!%p1267_p9)
}
 0x355   :  { %854 = dma.vmem_to_hbm [thread:$0]  %s849_s4, 512, %s1493_s6, [#allocation4], %s1281_s1, %s1281_s1, %s1282_s21  }
 0x356   :  { %1275 = dma.done.wait [#allocation4], 512  }
 0x357   :  { %1276 = vsyncadd [#allocation4], 4294966784 }
 0x358   :  { %858 = vsyncpa [#allocation3], 1 }
 0x359   :  { %859 = vsyncpa [#allocation6], 1 }
 0x35a   :  { %860 = vsyncpa [#allocation4], 1 }

</bundles_post_ra>
